<compile_context>
chip_gen: v6e
topology: v6e:2x2x1
jax: 0.10.0
libtpu: 0.0.40
codegen_flags: <defaults>
</compile_context>

<pallas_src>
import functools

import jax
import jax.numpy as jnp
from jax.experimental import pallas as pl
from jax.experimental.pallas import tpu as pltpu

H1, H2 = 256, 128  # hidden sizes fixed by the module


def _round_up(x, m):
    return (x + m - 1) // m * m


def _detect_num_tensorcores():
    """2 for chips whose TensorCores are shared per chip (v4 / v5p / v7x), else 1."""
    try:
        kind = jax.devices()[0].device_kind.lower()
    except Exception:  # pragma: no cover - backend not initialized / non-TPU
        return 1
    return 2 if any(tag in kind for tag in ("v7", "v4", "v5p")) else 1


_NUM_TC = _detect_num_tensorcores()


def vnet_kernel(x_ref, w1_ref, b1_ref, w2_ref, b2_ref, w3_ref, b3_ref, o_ref):
    # x tile: (TB, S) in f32 or bf16 -> bf16 once; MXU is bf16-native on v5e/v6e/v7x.
    x = x_ref[...].astype(jnp.bfloat16)

    # Layer 1: Linear(S, 256) + ReLU  (bf16 inputs, f32 accumulate, f32 epilogue)
    h1 = jnp.dot(x, w1_ref[...], preferred_element_type=jnp.float32)
    h1 = jnp.maximum(h1 + b1_ref[...], 0.0)

    # Layer 2: Linear(256, 128) + ReLU
    h2 = jnp.dot(h1.astype(jnp.bfloat16), w2_ref[...],
                 preferred_element_type=jnp.float32)
    h2 = jnp.maximum(h2 + b2_ref[...], 0.0)

    # Layer 3: Linear(128, 1), computed as (1,128) @ (TB,128)^T -> (1, TB) so the output
    # row is lane-dense (unmasked stores) instead of a (TB,1) masked column.
    # TODO(synk): if a bundle dump shows an XLU transpose of h2 on the critical path,
    # switch to jnp.sum(h2 * w3_row, axis=-1, keepdims=True) with a (TB,1) column store.
    out_row = jax.lax.dot_general(
        w3_ref[...], h2.astype(jnp.bfloat16),
        dimension_numbers=(((1,), (1,)), ((), ())),
        preferred_element_type=jnp.float32)            # (1, TB)
    o_ref[...] = (out_row + b3_ref[0]).astype(o_ref.dtype)


@functools.partial(jax.jit, static_argnames=("block_b",))
def vnetwork_forward(state, w1, b1, w2, b2, w3, b3, *, block_b=2048):
    """state: (B, S) float32 or bfloat16 (bf16 halves the dominant HBM stream).
    Param layout: w1 (S,256), b1 (256,), w2 (256,128), b2 (128,),
                  w3 (1,128) [PyTorch (out,in)], b3 (1,).
    Returns (B, 1) float32, matching the PyTorch module."""
    B, S = state.shape
    if state.dtype not in (jnp.float32, jnp.bfloat16):
        state = state.astype(jnp.float32)

    # Batch tile: multiple of 128 (lane-dense output rows), as large as block_b allows to
    # amortize per-grid-step overhead; on 2-TC chips clamp so the "parallel" grid axis has
    # >= 2 steps to shard across TensorCores.
    TB = min(block_b, _round_up(max(B, 1), 128))
    if _NUM_TC > 1 and B > 128:
        TB = min(TB, _round_up(pl.cdiv(B, _NUM_TC), 128))
    TB = max(TB, 128)
    G = pl.cdiv(max(B, 1), TB)

    # bf16 weights for the MXU (no-op casts if pre-cast via prepare_vnetwork_params);
    # biases / epilogue stay f32.
    w1b = w1.astype(jnp.bfloat16)
    w2b = w2.astype(jnp.bfloat16)
    w3b = w3.astype(jnp.bfloat16)
    b1f = b1.reshape(1, H1).astype(jnp.float32)
    b2f = b2.reshape(1, H2).astype(jnp.float32)
    b3f = b3.reshape(1).astype(jnp.float32)

    rows = G * TB
    flops = 2 * rows * (S * H1 + H1 * H2 + H2)
    bytes_accessed = (B * S * state.dtype.itemsize
                      + (w1b.size + w2b.size + w3b.size) * 2
                      + (b1f.size + b2f.size + b3f.size) * 4
                      + rows * 4)

    const = lambda shape: pl.BlockSpec(shape, lambda i, _s=shape: (0,) * len(_s))

    out = pl.pallas_call(
        vnet_kernel,
        out_shape=jax.ShapeDtypeStruct((G, 1, TB), jnp.float32),
        grid=(G,),
        in_specs=[
            # Streamed activations.  The last block may be ragged (B % TB != 0); its stale
            # rows only influence output rows >= B, which are discarded by [:B] below.
            # TODO(synk): on v5e, if xprof shows exposed input DMA after the TB raise, add
            # pipeline_mode=pl.Buffered(3) to this spec only.
            pl.BlockSpec((TB, S), lambda i: (i, 0)),
            const((S, H1)), const((1, H1)),                       # resident params
            const((H1, H2)), const((1, H2)),
            const((1, H2)),                                       # w3 row (1,128)
            pl.BlockSpec(memory_space=pltpu.MemorySpace.SMEM),    # b3 scalar in SMEM
        ],
        # One lane-dense (1, TB) row per grid step (leading dim squeezed in-kernel).
        out_specs=pl.BlockSpec((None, 1, TB), lambda i: (i, 0, 0)),
        compiler_params=pltpu.CompilerParams(
            dimension_semantics=("parallel",)),                   # shards grid over 2-TC chips
        cost_estimate=pl.CostEstimate(
            flops=flops, transcendentals=0, bytes_accessed=bytes_accessed),
    )(state, w1b, b1f, w2b, b2f, w3b, b3f)

    return out.reshape(G * TB, 1)[:B]


def prepare_vnetwork_params(w1, b1, w2, b2, w3, b3):
    """Pre-cast weights to bf16 once, outside the jitted forward, so the per-call casts
    inside vnetwork_forward become no-ops (smaller resident footprint, no per-call HBM
    round trip for the casts)."""
    return (w1.astype(jnp.bfloat16), b1.astype(jnp.float32),
            w2.astype(jnp.bfloat16), b2.astype(jnp.float32),
            w3.astype(jnp.bfloat16), b3.astype(jnp.float32))


def init_vnetwork_params(key, state_size):
    """PyTorch-default-like init: U(-1/sqrt(fan_in), 1/sqrt(fan_in)) for W and b.
    w1/w2 stored as (in, out) = W_pt.T; w3 stored in native (out, in) = (1, 128)."""
    dims = [(state_size, H1), (H1, H2), (H2, 1)]
    params = []
    for li, (fan_in, fan_out) in enumerate(dims):
        key, kw, kb = jax.random.split(key, 3)
        bound = 1.0 / float(fan_in) ** 0.5
        if li < 2:
            w = jax.random.uniform(kw, (fan_in, fan_out), jnp.float32, -bound, bound)
        else:
            w = jax.random.uniform(kw, (fan_out, fan_in), jnp.float32, -bound, bound)
        b = jax.random.uniform(kb, (fan_out,), jnp.float32, -bound, bound)
        params.extend([w, b])
    return tuple(params)


def vnetwork_ref_f32(state, w1, b1, w2, b2, w3, b3):
    h1 = jnp.maximum(state @ w1 + b1.reshape(1, -1), 0.0)
    h2 = jnp.maximum(h1 @ w2 + b2.reshape(1, -1), 0.0)
    return h2 @ w3.T + b3.reshape(1, -1)


def vnetwork_ref_bf16(state, w1, b1, w2, b2, w3, b3):
    bf = jnp.bfloat16
    h1 = jnp.dot(state.astype(bf), w1.astype(bf), preferred_element_type=jnp.float32)
    h1 = jnp.maximum(h1 + b1.reshape(1, -1).astype(jnp.float32), 0.0)
    h2 = jnp.dot(h1.astype(bf), w2.astype(bf), preferred_element_type=jnp.float32)
    h2 = jnp.maximum(h2 + b2.reshape(1, -1).astype(jnp.float32), 0.0)
    out = jnp.dot(h2.astype(bf), w3.astype(bf).T, preferred_element_type=jnp.float32)
    return out + b3.reshape(1, -1).astype(jnp.float32)


if __name__ == "__main__":
    key = jax.random.PRNGKey(0)
    state_size = 32
    batch = 8

    key, kparam, kstate = jax.random.split(key, 3)
    params_f32 = init_vnetwork_params(kparam, state_size)
    w1, b1, w2, b2, w3, b3 = params_f32
    params = prepare_vnetwork_params(*params_f32)     # bf16 weights, cast once up front

    state = jax.random.normal(kstate, (batch, state_size), jnp.float32)

    # Small-batch path (single ragged tile, no padding copy).
    out = jax.block_until_ready(vnetwork_forward(state, *params))
    assert out.shape == (batch, 1), out.shape

    ref_bf = vnetwork_ref_bf16(state, w1, b1, w2, b2, w3, b3)
    assert jnp.allclose(out, ref_bf, atol=2e-3, rtol=2e-3), "mismatch vs bf16-matched reference"

    ref_f32 = vnetwork_ref_f32(state, w1, b1, w2, b2, w3, b3)
    assert jnp.allclose(out, ref_f32, atol=5e-2, rtol=5e-2), "mismatch vs f32 reference"

    # Ragged multi-tile batch: exercises grid > 1, the no-pad ragged last block, and the
    # G>=2 megacore clamp on 2-TC parts.
    key, kbig = jax.random.split(key)
    state_big = jax.random.normal(kbig, (300, state_size), jnp.float32)
    out_big = jax.block_until_ready(vnetwork_forward(state_big, *params))
    assert out_big.shape == (300, 1), out_big.shape
    ref_big = vnetwork_ref_bf16(state_big, w1, b1, w2, b2, w3, b3)
    assert jnp.allclose(out_big, ref_big, atol=2e-3, rtol=2e-3), "mismatch on ragged batch"

    # bf16 activation ingestion (halves the dominant HBM stream; same kernel path).
    state_bf = state.astype(jnp.bfloat16)
    out_bf = jax.block_until_ready(vnetwork_forward(state_bf, *params))
    ref_bf_in = vnetwork_ref_bf16(state_bf, w1, b1, w2, b2, w3, b3)
    assert out_bf.shape == (batch, 1), out_bf.shape
    assert jnp.allclose(out_bf, ref_bf_in, atol=2e-3, rtol=2e-3), "mismatch on bf16 inputs"

    print("KERNEL_OK")
</pallas_src>

<mosaic_0001>
module attributes {stable_mosaic.version = 11 : i64} {
  func.func @vnet_kernel(%arg0: i32, %arg1: memref<128x32xf32, #tpu.memory_space<vmem>>, %arg2: memref<32x256xbf16, #tpu.memory_space<vmem>>, %arg3: memref<1x256xf32, #tpu.memory_space<vmem>>, %arg4: memref<256x128xbf16, #tpu.memory_space<vmem>>, %arg5: memref<1x128xf32, #tpu.memory_space<vmem>>, %arg6: memref<1x128xbf16, #tpu.memory_space<vmem>>, %arg7: memref<1xf32, #tpu.memory_space<smem>>, %arg8: memref<1x1x128xf32, #tpu.memory_space<vmem>>) attributes {dimension_semantics = [#tpu.dimension_semantics<parallel>], iteration_bounds = array<i64: 1>, scalar_prefetch = 0 : i64, scratch_operands = 0 : i64, tpu.core_type = #tpu.core_type<tc>, window_params = [{transform_indices = @transform_0, window_bounds = array<i64: 128, 32>}, {pipeline_mode = #tpu.pipeline_mode<synchronous>, transform_indices = @transform_1, window_bounds = array<i64: 32, 256>}, {pipeline_mode = #tpu.pipeline_mode<synchronous>, transform_indices = @transform_2, window_bounds = array<i64: 1, 256>}, {pipeline_mode = #tpu.pipeline_mode<synchronous>, transform_indices = @transform_3, window_bounds = array<i64: 256, 128>}, {pipeline_mode = #tpu.pipeline_mode<synchronous>, transform_indices = @transform_4, window_bounds = array<i64: 1, 128>}, {pipeline_mode = #tpu.pipeline_mode<synchronous>, transform_indices = @transform_5, window_bounds = array<i64: 1, 128>}, {transform_indices = @transform_6, window_bounds = array<i64: 1>}, {transform_indices = @transform_7, window_bounds = array<i64: 1, 1, 128>}]} {
    %c0 = arith.constant 0 : index
    %c0_0 = arith.constant 0 : index
    %0 = vector.load %arg1[%c0, %c0_0] : memref<128x32xf32, #tpu.memory_space<vmem>>, vector<128x32xf32>
    %1 = arith.truncf %0 : vector<128x32xf32> to vector<128x32xbf16>
    %c0_1 = arith.constant 0 : index
    %c0_2 = arith.constant 0 : index
    %2 = vector.load %arg2[%c0_1, %c0_2] : memref<32x256xbf16, #tpu.memory_space<vmem>>, vector<32x256xbf16>
    %cst = arith.constant dense<0.000000e+00> : vector<128x256xf32>
    %3 = tpu.matmul %1, %2, %cst {dimension_numbers = #tpu.dot_dimension_numbers<[1], [0], [0], [1], [0, 0, 1, 1], [], []>} : vector<128x32xbf16>, vector<32x256xbf16>, vector<128x256xf32> -> vector<128x256xf32>
    %c0_3 = arith.constant 0 : index
    %c0_4 = arith.constant 0 : index
    %4 = vector.load %arg3[%c0_3, %c0_4] : memref<1x256xf32, #tpu.memory_space<vmem>>, vector<1x256xf32>
    %5 = vector.broadcast %4 : vector<1x256xf32> to vector<128x256xf32>
    %6 = arith.addf %3, %5 : vector<128x256xf32>
    %cst_5 = arith.constant 0.000000e+00 : f32
    %7 = vector.broadcast %cst_5 : f32 to vector<128x256xf32>
    %8 = arith.maximumf %6, %7 : vector<128x256xf32>
    %9 = arith.truncf %8 : vector<128x256xf32> to vector<128x256xbf16>
    %c0_6 = arith.constant 0 : index
    %c0_7 = arith.constant 0 : index
    %10 = vector.load %arg4[%c0_6, %c0_7] : memref<256x128xbf16, #tpu.memory_space<vmem>>, vector<256x128xbf16>
    %cst_8 = arith.constant dense<0.000000e+00> : vector<128x128xf32>
    %11 = tpu.matmul %9, %10, %cst_8 {dimension_numbers = #tpu.dot_dimension_numbers<[1], [0], [0], [1], [0, 0, 1, 1], [], []>} : vector<128x256xbf16>, vector<256x128xbf16>, vector<128x128xf32> -> vector<128x128xf32>
    %c0_9 = arith.constant 0 : index
    %c0_10 = arith.constant 0 : index
    %12 = vector.load %arg5[%c0_9, %c0_10] : memref<1x128xf32, #tpu.memory_space<vmem>>, vector<1x128xf32>
    %13 = vector.broadcast %12 : vector<1x128xf32> to vector<128x128xf32>
    %14 = arith.addf %11, %13 : vector<128x128xf32>
    %cst_11 = arith.constant 0.000000e+00 : f32
    %15 = vector.broadcast %cst_11 : f32 to vector<128x128xf32>
    %16 = arith.maximumf %14, %15 : vector<128x128xf32>
    %c0_12 = arith.constant 0 : index
    %c0_13 = arith.constant 0 : index
    %17 = vector.load %arg6[%c0_12, %c0_13] : memref<1x128xbf16, #tpu.memory_space<vmem>>, vector<1x128xbf16>
    %18 = arith.truncf %16 : vector<128x128xf32> to vector<128x128xbf16>
    %cst_14 = arith.constant dense<0.000000e+00> : vector<1x128xf32>
    %19 = tpu.matmul %17, %18, %cst_14 {dimension_numbers = #tpu.dot_dimension_numbers<[1], [1], [0], [0], [0, 0, 1, 0], [], []>} : vector<1x128xbf16>, vector<128x128xbf16>, vector<1x128xf32> -> vector<1x128xf32>
    %c0_15 = arith.constant 0 : index
    %20 = memref.load %arg7[%c0_15] : memref<1xf32, #tpu.memory_space<smem>>
    %21 = vector.broadcast %20 : f32 to vector<1x128xf32>
    %22 = arith.addf %19, %21 : vector<1x128xf32>
    %c0_16 = arith.constant 0 : index
    %c0_17 = arith.constant 0 : index
    %c0_18 = arith.constant 0 : index
    %23 = vector.load %arg8[%c0_16, %c0_17, %c0_18] : memref<1x1x128xf32, #tpu.memory_space<vmem>>, vector<1x1x128xf32>
    %24 = vector.shape_cast %23 : vector<1x1x128xf32> to vector<1x128xf32>
    %25 = vector.shape_cast %22 : vector<1x128xf32> to vector<1x1x128xf32>
    tpu.vector_store %arg8[%c0_16, %c0_17, %c0_18], %25 {strides = array<i32>} : memref<1x1x128xf32, #tpu.memory_space<vmem>>, vector<1x1x128xf32>,
    return
  }
  func.func @transform_0(%arg0: i32) -> (i32, i32) {
    %c0_i32 = arith.constant 0 : i32
    %c0_i32_0 = arith.constant 0 : i32
    return %arg0, %c0_i32 : i32, i32
  }
  func.func @transform_1(%arg0: i32) -> (i32, i32) {
    %c0_i32 = arith.constant 0 : i32
    %c0_i32_0 = arith.constant 0 : i32
    %c0_i32_1 = arith.constant 0 : i32
    return %c0_i32, %c0_i32_0 : i32, i32
  }
  func.func @transform_2(%arg0: i32) -> (i32, i32) {
    %c0_i32 = arith.constant 0 : i32
    %c0_i32_0 = arith.constant 0 : i32
    %c0_i32_1 = arith.constant 0 : i32
    return %c0_i32, %c0_i32_0 : i32, i32
  }
  func.func @transform_3(%arg0: i32) -> (i32, i32) {
    %c0_i32 = arith.constant 0 : i32
    %c0_i32_0 = arith.constant 0 : i32
    %c0_i32_1 = arith.constant 0 : i32
    return %c0_i32, %c0_i32_0 : i32, i32
  }
  func.func @transform_4(%arg0: i32) -> (i32, i32) {
    %c0_i32 = arith.constant 0 : i32
    %c0_i32_0 = arith.constant 0 : i32
    %c0_i32_1 = arith.constant 0 : i32
    return %c0_i32, %c0_i32_0 : i32, i32
  }
  func.func @transform_5(%arg0: i32) -> (i32, i32) {
    %c0_i32 = arith.constant 0 : i32
    %c0_i32_0 = arith.constant 0 : i32
    %c0_i32_1 = arith.constant 0 : i32
    return %c0_i32, %c0_i32_0 : i32, i32
  }
  func.func @transform_6(%arg0: i32) -> i32 {
    %c0_i32 = arith.constant 0 : i32
    %c0_i32_0 = arith.constant 0 : i32
    return %c0_i32 : i32
  }
  func.func @transform_7(%arg0: i32) -> (i32, i32, i32) {
    %c0_i32 = arith.constant 0 : i32
    %c0_i32_0 = arith.constant 0 : i32
    %c0_i32_1 = arith.constant 0 : i32
    return %arg0, %c0_i32, %c0_i32_0 : i32, i32, i32
  }
}

</mosaic_0001>

<bundles_post_ra>
// kernel: vnetwork_forward.1
= control target key start
LH: loop header
LB: loop body
LE: loop exit
PB: predicated region body
PF: predicated region fallthrough
CT: control target
= control target key end

     0   :  { %13 = vsyncpa [#allocation4], 0  ;;  %s998_s0 = inlined_call_operand.hbm [shape: f32[8,32], index: 0, kind: input, shape index: {}]   ;;  %s999_s1 = inlined_call_operand.hbm [shape: bf16[32,256], index: 1, kind: input, shape index: {}]   ;;  %s1000_s2 = inlined_call_operand.vmem [shape: f32[1,256], index: 2, kind: input, shape index: {}]   ;;  %s1001_s3 = inlined_call_operand.hbm [shape: bf16[256,128], index: 3, kind: input, shape index: {}]   ;;  %s1002_s4 = inlined_call_operand.vmem [shape: f32[1,128], index: 4, kind: input, shape index: {}]   ;;  %s1003_s5 = inlined_call_operand.vmem [shape: bf16[1,128], index: 5, kind: input, shape index: {}]   ;;  %s1004_s6 = inlined_call_operand.<no memory space> [shape: f32[1], index: 6, kind: input, shape index: {}]   ;;  %s1005_s7 = inlined_call_operand.vmem [shape: f32[1,1,128], index: 7, kind: output, shape index: {}]  }
   0x1   :  { %14 = vsyncpa [#allocation6], 0 }
   0x2   :  { %19 = vsyncadd [#allocation4], 1920  ;;  %s839_s24 = smov [#allocation5]   ;;  %s840_s26 = smov [#allocation3]  }
   0x3   :  { %s32_s25 = sshll.u32 %s839_s24, 4  ;;  %s20_s27 = sshll.u32 %s840_s26, 4  ;;  %s33_s25 = int_to_ptr.vmem [resolvable:$true] %s32_s25  ;;  %s21_s27 = int_to_ptr.vmem [resolvable:$true] %s20_s27 }
   0x4   :  { %s783_s28 = scalar_lea.vmem %s33_s25, 512  ;;  %p788_p1 = scmp.lt.s32.totalorder %s33_s25, %s33_s25 }
   0x5   :  { %p784_p0 = scmp.ne.s32.totalorder %s33_s25, %s783_s28  ;;  %p789_p2 = scmp.lt.s32.totalorder %s783_s28, %s783_s28 }
   0x7   :  { %p790_p3 = por %p789_p2, %p788_p1 }
   0x9   :  { %p791_p4 = pnand %p790_p3, %p784_p0 }
   0xb   :  { %794 = shalt.err (!%p791_p4)
}
   0xc   :  { %s841_s29 = smov 128   ;;  %s842_s30 = smov 8  }
   0xd   :  { %38 = dma.hbm_to_vmem [thread:$0]  %s999_s1, 512, %s33_s25, [#allocation6], %s841_s29, %s841_s29, %s842_s30  }
   0xe   :  { %s803_s10 = scalar_lea.vmem %s21_s27, 128  ;;  %s807_s11 = scalar_lea.vmem %s21_s27, 2048 }
   0xf   :  { %p804_p5 = scmp.ne.s32.totalorder %s21_s27, %s803_s10  ;;  %p808_p6 = scmp.lt.s32.totalorder %s21_s27, %s21_s27 }
  0x10   :  { %p809_p7 = scmp.lt.s32.totalorder %s807_s11, %s803_s10 }
  0x12   :  { %p810_p8 = por %p809_p7, %p808_p6 }
  0x14   :  { %p811_p9 = pnand %p810_p8, %p804_p5 }
  0x16   :  { %814 = shalt.err (!%p811_p9)
}
  0x17   :  { %26 = dma.hbm_to_vmem [thread:$0]  %s998_s0, 128, %s21_s27, [#allocation4], %s841_s29, %s841_s29, %s842_s30  }
  0x18   :  { %s843_s14 = smov [#allocation7]  }
  0x19   :  { %s46_s15 = sshll.u32 %s843_s14, 4  ;;  %s47_s15 = int_to_ptr.vmem [resolvable:$true] %s46_s15 }
  0x1a   :  { %s823_s16 = scalar_lea.vmem %s47_s15, 2048  ;;  %p828_p11 = scmp.lt.s32.totalorder %s47_s15, %s47_s15 }
  0x1b   :  { %p824_p10 = scmp.ne.s32.totalorder %s47_s15, %s823_s16  ;;  %p829_p12 = scmp.lt.s32.totalorder %s823_s16, %s823_s16 }
  0x1d   :  { %p830_p13 = por %p829_p12, %p828_p11 }
  0x1f   :  { %p831_p0 = pnand %p830_p13, %p824_p10 }
  0x21   :  { %834 = shalt.err (!%p831_p0)
}
  0x22   :  { %s844_s1 = smov 64   ;;  %s845_s17 = smov 4  }
  0x23   :  { %52 = dma.hbm_to_vmem [thread:$0]  %s1001_s3, 2048, %s47_s15, [#allocation6], %s844_s1, %s844_s1, %s845_s17  }
  0x24   :  { %835 = dma.done.wait [#allocation4], 2048  }
  0x25   :  { %836 = vsyncadd [#allocation4], 4294965248 }
  0x26   :  { %837 = dma.done.wait [#allocation6], 2560  }
  0x27   :  { %838 = vsyncadd [#allocation6], 4294964736  ;;  %v846_v0 = vmov 0   ;;  %v753_v1 = vld [vmem:[#allocation5 + $0x14] ss:$8 sps:$4 sm:$0xff]   ;;  %v69_v5 = vld [vmem:[#allocation3] sm:$0xff]  ;;  %v99_v45 = vlaneseq }
  0x28   :  { %186 = vmatprep.mubr.bf16.mxu0 %v846_v0  ;;  %v755_v2 = vld [vmem:[#allocation5 + $0x10] ss:$8 sps:$4 sm:$0xff]   ;;  %166 = vmatprep.subr.bf16.mxu0 %v753_v1  ;;  %v756_v3 = vld [vmem:[#allocation5 + $0x4] ss:$8 sps:$4 sm:$0xff]   ;;  %v758_v4 = vld [vmem:[#allocation5] ss:$8 sps:$4 sm:$0xff]  }
  0x29   :  { %167 = vmatpush1.bf16.msra.mxu0 %v755_v2  ;;  %v70_v6 = vld [vmem:[#allocation3 + $0x8] sm:$0xff]  ;;  %vm129_vm0 = vcmask 261120   ;;  %v759_v8 = vld [vmem:[#allocation7 + $0x78] sm:$0xff]   ;;  %v71_v9 = vld [vmem:[#allocation3 + $0x10] sm:$0xff]  ;;  %v100_v46 = vshrl.u32 %v99_v45, 7  ;;  %vm848_vm1 = vmmov 0  }
  0x2a   :  { %168 = vmatprep.subr.bf16.mxu0 %v756_v3  ;;  %v85_v7 = vpack.c.bf16 %v70_v6, %v69_v5  ;;  %v72_v10 = vld [vmem:[#allocation3 + $0x18] sm:$0xff]  ;;  %650 = vmatprep.subr.bf16.mxu1 %v759_v8  ;;  %v761_v12 = vld [vmem:[#allocation7 + $0x70] sm:$0xff]   ;;  %v763_v14 = vld [vmem:[#allocation7 + $0x68] sm:$0xff]  }
  0x2b   :  { %v760_v11 = vld [vmem:[#allocation7 + $0x38] sm:$0xff]   ;;  %v762_v13 = vld [vmem:[#allocation7 + $0x30] sm:$0xff]   ;;  %v86_v15 = vpack.c.bf16 %v72_v10, %v71_v9  ;;  %v764_v16 = vld [vmem:[#allocation7 + $0x28] sm:$0xff]   ;;  %v105_v47 = vsub.s32 1, %v100_v46  ;;  %v101_v48 = vsub.s32 0, %v100_v46 }
  0x2c   :  { %651 = vmatpush3.bf16.msra.mxu1 %v760_v11  ;;  %v765_v17 = vld [vmem:[#allocation7 + $0x60] sm:$0xff]   ;;  %v74_v19 = vld [vmem:[#allocation3 + $0x28] sm:$0xff]  ;;  %v767_v21 = vld [vmem:[#allocation7 + $0x58] sm:$0xff]  }
  0x2d   :  { %169 = vmatpush1.bf16.msra.mxu0 %v758_v4  ;;  %652 = vmatprep.subr.bf16.mxu1 %v761_v12  ;;  %v73_v18 = vld [vmem:[#allocation3 + $0x20] sm:$0xff]  ;;  %v768_v23 = vld [vmem:[#allocation7 + $0x18] sm:$0xff]   ;;  %v75_v24 = vld [vmem:[#allocation3 + $0x30] sm:$0xff] }
  0x2e   :  { %v766_v20 = vld [vmem:[#allocation7 + $0x20] sm:$0xff]   ;;  %v87_v22 = vpack.c.bf16 %v74_v19, %v73_v18  ;;  %v76_v25 = vld [vmem:[#allocation3 + $0x38] sm:$0xff]  ;;  %v78_v28 = vld [vmem:[#allocation3 + $0x48] sm:$0xff] }
  0x2f   :  { %v88_v26 = vpack.c.bf16 %v76_v25, %v75_v24  ;;  %v77_v27 = vld [vmem:[#allocation3 + $0x40] sm:$0xff]  ;;  %v79_v30 = vld [vmem:[#allocation3 + $0x50] sm:$0xff]  ;;  %v80_v31 = vld [vmem:[#allocation3 + $0x58] sm:$0xff] }
  0x30   :  { %625 = vmatmul.mubr.msk.bf16.vlgmr.msra.gmra.mxu0 %vm129_vm0, %v85_v7  ;;  %653 = vmatpush3.bf16.msra.mxu1 %v762_v13  ;;  %v89_v29 = vpack.c.bf16 %v78_v28, %v77_v27  ;;  %v90_v32 = vpack.c.bf16 %v80_v31, %v79_v30  ;;  %v81_v33 = vld [vmem:[#allocation3 + $0x60] sm:$0xff]  ;;  %v82_v34 = vld [vmem:[#allocation3 + $0x68] sm:$0xff]  ;;  %v83_v36 = vld [vmem:[#allocation3 + $0x70] sm:$0xff] }
  0x31   :  { %196 = vmatprep.mubr.bf16.mxu0 %v846_v0  ;;  %654 = vmatprep.subr.bf16.mxu1 %v763_v14  ;;  %v91_v35 = vpack.c.bf16 %v82_v34, %v81_v33  ;;  %v84_v37 = vld [vmem:[#allocation3 + $0x78] sm:$0xff]  ;;  %v769_v39 = vld [vmem:[#allocation7 + $0x50] sm:$0xff]   ;;  %v771_v41 = vld [vmem:[#allocation7 + $0x48] sm:$0xff]  }
  0x32   :  { %v92_v38 = vpack.c.bf16 %v84_v37, %v83_v36  ;;  %v770_v40 = vld [vmem:[#allocation7 + $0x10] sm:$0xff]   ;;  %v772_v42 = vld [vmem:[#allocation7 + $0x8] sm:$0xff]   ;;  %v773_v43 = vld [vmem:[#allocation7 + $0x40] sm:$0xff]  }
  0x33   :  { %v774_v44 = vld [vmem:[#allocation7] sm:$0xff]  }
  0x34   :  { %655 = vmatpush3.bf16.msra.mxu1 %v764_v16  ;;  %v97_v49 = vld [vmem:[%s1000_s2] sm:$0x3] }
  0x35   :  { %656 = vmatprep.subr.bf16.mxu1 %v765_v17  ;;  %v917_v51 = vrot.slane %v97_v49, %v105_v47  ;;  %v919_v52 = vrot.slane %v97_v49, %v101_v48 }
  0x38   :  { %626 = vmatmul.mubr.msk.bf16.gmra.mxu0 %vm129_vm0, %v86_v15  ;;  %657 = vmatpush3.bf16.msra.mxu1 %v766_v20 }
  0x39   :  { %206 = vmatprep.mubr.bf16.mxu0 %v846_v0  ;;  %658 = vmatprep.subr.bf16.mxu1 %v767_v21 }
  0x3c   :  { %659 = vmatpush3.bf16.msra.mxu1 %v768_v23 }
  0x3d   :  { %660 = vmatprep.subr.bf16.mxu1 %v769_v39 }
  0x40   :  { %627 = vmatmul.mubr.msk.bf16.gmra.mxu0 %vm129_vm0, %v87_v22  ;;  %661 = vmatpush3.bf16.msra.mxu1 %v770_v40 }
  0x41   :  { %216 = vmatprep.mubr.bf16.mxu0 %v846_v0  ;;  %662 = vmatprep.subr.bf16.mxu1 %v771_v41 }
  0x44   :  { %663 = vmatpush3.bf16.msra.mxu1 %v772_v42 }
  0x45   :  { %664 = vmatprep.subr.bf16.mxu1 %v773_v43 }
  0x48   :  { %628 = vmatmul.mubr.msk.bf16.gmra.mxu0 %vm129_vm0, %v88_v26  ;;  %665 = vmatpush3.bf16.msra.mxu1 %v774_v44 }
  0x49   :  { %226 = vmatprep.mubr.bf16.mxu0 %v846_v0 }
  0x50   :  { %629 = vmatmul.mubr.msk.bf16.gmra.mxu0 %vm129_vm0, %v89_v29 }
  0x51   :  { %236 = vmatprep.mubr.bf16.mxu0 %v846_v0 }
  0x58   :  { %630 = vmatmul.mubr.msk.bf16.gmra.mxu0 %vm129_vm0, %v90_v32 }
  0x59   :  { %246 = vmatprep.mubr.bf16.mxu0 %v846_v0 }
  0x60   :  { %631 = vmatmul.mubr.msk.bf16.gmra.mxu0 %vm129_vm0, %v91_v35 }
  0x61   :  { %256 = vmatprep.mubr.bf16.mxu0 %v846_v0 }
  0x68   :  { %632 = vmatmul.mubr.msk.bf16.gmra.mxu0 %vm129_vm0, %v92_v38 }
  0xf0   :  { %v188_v50 = vpop.f32.mrf.mxu0 }
  0xf1   :  { %v189_v57 = vadd.f32 %v188_v50, %v919_v52 }
  0xf2   :  { %v190_v53 = vpop.f32.mrf.mxu0 }
  0xf3   :  { %v191_v55 = vadd.f32 %v190_v53, %v917_v51  ;;  %v267_v0 = vmax.f32 %v189_v57, 0.0 }
  0xf4   :  { %v192_v54 = vpop.f32.mrf.mxu0 }
  0xf5   :  { %v193_v56 = vadd.f32 %v192_v54, %v919_v52  ;;  %v268_v62 = vmax.f32 %v191_v55, 0.0 }
  0xf6   :  { %v194_v58 = vpop.f32.mrf.mxu0 }
  0xf7   :  { %v195_v59 = vadd.f32 %v194_v58, %v917_v51  ;;  %v269_v60 = vmax.f32 %v193_v56, 0.0 }
  0xf8   :  { %v198_v61 = vpop.f32.mrf.mxu0 }
  0xf9   :  { %v270_v63 = vmax.f32 %v195_v59, 0.0  ;;  %v299_v3 = vpack.c.bf16 %v269_v60, %v267_v0  ;;  %v199_v7 = vadd.f32 %v198_v61, %v919_v52 }
  0xfa   :  { %v200_v1 = vpop.f32.mrf.mxu0 }
  0xfb   :  { %v300_v2 = vpack.c.bf16 %v270_v63, %v268_v62  ;;  %v201_v5 = vadd.f32 %v200_v1, %v917_v51  ;;  %v271_v14 = vmax.f32 %v199_v7, 0.0 }
  0xfc   :  { %v202_v4 = vpop.f32.mrf.mxu0 }
  0xfd   :  { %v203_v6 = vadd.f32 %v202_v4, %v919_v52  ;;  %482 = vmatprep.mubr.bf16.mxu1 %v300_v2  ;;  %v272_v12 = vmax.f32 %v201_v5, 0.0 }
  0xfe   :  { %v204_v8 = vpop.f32.mrf.mxu0  ;;  %483 = vmatmul.mubr.bf16.vlgmr.msra.gmra.mxu1 %v299_v3 }
  0xff   :  { %v205_v9 = vadd.f32 %v204_v8, %v917_v51  ;;  %v273_v10 = vmax.f32 %v203_v6, 0.0 }
 0x100   :  { %v208_v11 = vpop.f32.mrf.mxu0 }
 0x101   :  { %v274_v13 = vmax.f32 %v205_v9, 0.0  ;;  %v301_v17 = vpack.c.bf16 %v273_v10, %v271_v14  ;;  %v209_v21 = vadd.f32 %v208_v11, %v919_v52 }
 0x102   :  { %v210_v15 = vpop.f32.mrf.mxu0 }
 0x103   :  { %v302_v16 = vpack.c.bf16 %v274_v13, %v272_v12  ;;  %v211_v19 = vadd.f32 %v210_v15, %v917_v51  ;;  %v275_v28 = vmax.f32 %v209_v21, 0.0 }
 0x104   :  { %v212_v18 = vpop.f32.mrf.mxu0 }
 0x105   :  { %v213_v20 = vadd.f32 %v212_v18, %v919_v52  ;;  %490 = vmatprep.mubr.bf16.mxu1 %v302_v16  ;;  %v276_v26 = vmax.f32 %v211_v19, 0.0 }
 0x106   :  { %v214_v22 = vpop.f32.mrf.mxu0  ;;  %491 = vmatmul.mubr.bf16.gmra.mxu1 %v301_v17 }
 0x107   :  { %v215_v23 = vadd.f32 %v214_v22, %v917_v51  ;;  %v277_v24 = vmax.f32 %v213_v20, 0.0 }
 0x108   :  { %v218_v25 = vpop.f32.mrf.mxu0 }
 0x109   :  { %v278_v27 = vmax.f32 %v215_v23, 0.0  ;;  %v303_v31 = vpack.c.bf16 %v277_v24, %v275_v28  ;;  %v219_v35 = vadd.f32 %v218_v25, %v919_v52 }
 0x10a   :  { %v220_v29 = vpop.f32.mrf.mxu0 }
 0x10b   :  { %v304_v30 = vpack.c.bf16 %v278_v27, %v276_v26  ;;  %v221_v33 = vadd.f32 %v220_v29, %v917_v51  ;;  %v279_v42 = vmax.f32 %v219_v35, 0.0 }
 0x10c   :  { %v222_v32 = vpop.f32.mrf.mxu0 }
 0x10d   :  { %v223_v34 = vadd.f32 %v222_v32, %v919_v52  ;;  %498 = vmatprep.mubr.bf16.mxu1 %v304_v30  ;;  %v280_v40 = vmax.f32 %v221_v33, 0.0 }
 0x10e   :  { %v224_v36 = vpop.f32.mrf.mxu0  ;;  %499 = vmatmul.mubr.bf16.gmra.mxu1 %v303_v31 }
 0x10f   :  { %v225_v37 = vadd.f32 %v224_v36, %v917_v51  ;;  %v281_v38 = vmax.f32 %v223_v34, 0.0 }
 0x110   :  { %v228_v39 = vpop.f32.mrf.mxu0 }
 0x111   :  { %v282_v41 = vmax.f32 %v225_v37, 0.0  ;;  %v305_v45 = vpack.c.bf16 %v281_v38, %v279_v42  ;;  %v229_v49 = vadd.f32 %v228_v39, %v919_v52  ;;  %v847_v38 = vmov 0.0  }
 0x112   :  { %v230_v43 = vpop.f32.mrf.mxu0  ;;  %723 = vmatprep.subr.bf16.mxu0 %v847_v38  ;;  %739 = vmatprep.mubr.msk.bf16.mxu0 %vm848_vm1, %v847_v38 }
 0x113   :  { %v306_v44 = vpack.c.bf16 %v282_v41, %v280_v40  ;;  %v231_v47 = vadd.f32 %v230_v43, %v917_v51  ;;  %v283_v58 = vmax.f32 %v229_v49, 0.0 }
 0x114   :  { %v232_v46 = vpop.f32.mrf.mxu0 }
 0x115   :  { %v233_v48 = vadd.f32 %v232_v46, %v919_v52  ;;  %506 = vmatprep.mubr.bf16.mxu1 %v306_v44  ;;  %v284_v56 = vmax.f32 %v231_v47, 0.0 }
 0x116   :  { %v234_v50 = vpop.f32.mrf.mxu0  ;;  %507 = vmatmul.mubr.bf16.gmra.mxu1 %v305_v45 }
 0x117   :  { %v235_v53 = vadd.f32 %v234_v50, %v917_v51  ;;  %v285_v54 = vmax.f32 %v233_v48, 0.0 }
 0x118   :  { %v238_v55 = vpop.f32.mrf.mxu0 }
 0x119   :  { %v286_v57 = vmax.f32 %v235_v53, 0.0  ;;  %v307_v61 = vpack.c.bf16 %v285_v54, %v283_v58  ;;  %v239_v1 = vadd.f32 %v238_v55, %v919_v52 }
 0x11a   :  { %v240_v59 = vpop.f32.mrf.mxu0 }
 0x11b   :  { %v308_v60 = vpack.c.bf16 %v286_v57, %v284_v56  ;;  %v241_v63 = vadd.f32 %v240_v59, %v917_v51  ;;  %v287_v8 = vmax.f32 %v239_v1, 0.0 }
 0x11c   :  { %v242_v62 = vpop.f32.mrf.mxu0 }
 0x11d   :  { %v243_v0 = vadd.f32 %v242_v62, %v919_v52  ;;  %514 = vmatprep.mubr.bf16.mxu1 %v308_v60  ;;  %v288_v6 = vmax.f32 %v241_v63, 0.0 }
 0x11e   :  { %v244_v2 = vpop.f32.mrf.mxu0  ;;  %515 = vmatmul.mubr.bf16.gmra.mxu1 %v307_v61 }
 0x11f   :  { %v245_v3 = vadd.f32 %v244_v2, %v917_v51  ;;  %v289_v4 = vmax.f32 %v243_v0, 0.0 }
 0x120   :  { %v248_v5 = vpop.f32.mrf.mxu0 }
 0x121   :  { %v290_v7 = vmax.f32 %v245_v3, 0.0  ;;  %v309_v11 = vpack.c.bf16 %v289_v4, %v287_v8  ;;  %v249_v15 = vadd.f32 %v248_v5, %v919_v52 }
 0x122   :  { %v250_v9 = vpop.f32.mrf.mxu0 }
 0x123   :  { %v310_v10 = vpack.c.bf16 %v290_v7, %v288_v6  ;;  %v251_v13 = vadd.f32 %v250_v9, %v917_v51  ;;  %v291_v22 = vmax.f32 %v249_v15, 0.0 }
 0x124   :  { %v252_v12 = vpop.f32.mrf.mxu0 }
 0x125   :  { %v253_v14 = vadd.f32 %v252_v12, %v919_v52  ;;  %522 = vmatprep.mubr.bf16.mxu1 %v310_v10  ;;  %v292_v20 = vmax.f32 %v251_v13, 0.0 }
 0x126   :  { %v254_v16 = vpop.f32.mrf.mxu0  ;;  %523 = vmatmul.mubr.bf16.gmra.mxu1 %v309_v11 }
 0x127   :  { %v255_v17 = vadd.f32 %v254_v16, %v917_v51  ;;  %v293_v18 = vmax.f32 %v253_v14, 0.0 }
 0x128   :  { %v258_v19 = vpop.f32.mrf.mxu0 }
 0x129   :  { %v294_v21 = vmax.f32 %v255_v17, 0.0  ;;  %v311_v25 = vpack.c.bf16 %v293_v18, %v291_v22  ;;  %v259_v29 = vadd.f32 %v258_v19, %v919_v52 }
 0x12a   :  { %v260_v23 = vpop.f32.mrf.mxu0 }
 0x12b   :  { %v312_v24 = vpack.c.bf16 %v294_v21, %v292_v20  ;;  %v261_v27 = vadd.f32 %v260_v23, %v917_v51  ;;  %v295_v35 = vmax.f32 %v259_v29, 0.0 }
 0x12c   :  { %v262_v26 = vpop.f32.mrf.mxu0 }
 0x12d   :  { %v263_v28 = vadd.f32 %v262_v26, %v919_v52  ;;  %530 = vmatprep.mubr.bf16.mxu1 %v312_v24  ;;  %v296_v33 = vmax.f32 %v261_v27, 0.0 }
 0x12e   :  { %v264_v30 = vpop.f32.mrf.mxu0  ;;  %531 = vmatmul.mubr.bf16.gmra.mxu1 %v311_v25 }
 0x12f   :  { %v265_v31 = vadd.f32 %v264_v30, %v917_v51  ;;  %v297_v32 = vmax.f32 %v263_v28, 0.0  ;;  %v958_v51 = vld [vmem:[%s1002_s4] ss:$0 sm:$0xff] }
 0x131   :  { %v298_v34 = vmax.f32 %v265_v31, 0.0  ;;  %v313_v37 = vpack.c.bf16 %v297_v32, %v295_v35 }
 0x133   :  { %v314_v36 = vpack.c.bf16 %v298_v34, %v296_v33 }
 0x135   :  { %538 = vmatprep.mubr.bf16.mxu1 %v314_v36 }
 0x136   :  { %539 = vmatmul.mubr.bf16.gmra.mxu1 %v313_v37 }
 0x1be   :  { %v666_v39 = vpop.f32.mrf.mxu1 }
 0x1c0   :  { %v667_v52 = vpop.f32.mrf.mxu1 }
 0x1c1   :  { %v668_v40 = vadd.f32 %v667_v52, %v666_v39 }
 0x1c2   :  { %v669_v41 = vpop.f32.mrf.mxu1 }
 0x1c3   :  { %v485_v43 = vadd.f32 %v668_v40, %v958_v51 }
 0x1c4   :  { %v670_v42 = vpop.f32.mrf.mxu1 }
 0x1c5   :  { %v671_v44 = vadd.f32 %v670_v42, %v669_v41  ;;  %v547_v48 = vmax.f32 %v485_v43, 0.0 }
 0x1c6   :  { %v672_v45 = vpop.f32.mrf.mxu1 }
 0x1c7   :  { %v488_v46 = vadd.f32 %v671_v44, %v958_v51 }
 0x1c8   :  { %v673_v47 = vpop.f32.mrf.mxu1 }
 0x1c9   :  { %v548_v49 = vmax.f32 %v488_v46, 0.0  ;;  %v674_v50 = vadd.f32 %v673_v47, %v672_v45 }
 0x1ca   :  { %v675_v53 = vpop.f32.mrf.mxu1 }
 0x1cb   :  { %v962_v54 = vpack.c.bf16 %v548_v49, %v547_v48  ;;  %v493_v56 = vadd.f32 %v674_v50, %v958_v51 }
 0x1cc   :  { %v676_v55 = vpop.f32.mrf.mxu1 }
 0x1cd   :  { %v677_v57 = vadd.f32 %v676_v55, %v675_v53  ;;  %v549_v61 = vmax.f32 %v493_v56, 0.0 }
 0x1ce   :  { %v678_v58 = vpop.f32.mrf.mxu1 }
 0x1cf   :  { %v496_v59 = vadd.f32 %v677_v57, %v958_v51 }
 0x1d0   :  { %v679_v60 = vpop.f32.mrf.mxu1 }
 0x1d1   :  { %v550_v62 = vmax.f32 %v496_v59, 0.0  ;;  %v680_v63 = vadd.f32 %v679_v60, %v678_v58 }
 0x1d2   :  { %v681_v0 = vpop.f32.mrf.mxu1 }
 0x1d3   :  { %v966_v1 = vpack.c.bf16 %v550_v62, %v549_v61  ;;  %v501_v3 = vadd.f32 %v680_v63, %v958_v51 }
 0x1d4   :  { %v682_v2 = vpop.f32.mrf.mxu1 }
 0x1d5   :  { %v683_v4 = vadd.f32 %v682_v2, %v681_v0  ;;  %v551_v8 = vmax.f32 %v501_v3, 0.0 }
 0x1d6   :  { %v684_v5 = vpop.f32.mrf.mxu1 }
 0x1d7   :  { %v504_v6 = vadd.f32 %v683_v4, %v958_v51  ;;  %v573_v4 = vstv %s1004_s6 }
 0x1d8   :  { %v685_v7 = vpop.f32.mrf.mxu1 }
 0x1d9   :  { %v552_v9 = vmax.f32 %v504_v6, 0.0  ;;  %v686_v10 = vadd.f32 %v685_v7, %v684_v5 }
 0x1da   :  { %v687_v11 = vpop.f32.mrf.mxu1 }
 0x1db   :  { %v566_v12 = vpack.c.bf16 %v552_v9, %v551_v8  ;;  %v509_v14 = vadd.f32 %v686_v10, %v958_v51 }
 0x1dc   :  { %v688_v13 = vpop.f32.mrf.mxu1 }
 0x1dd   :  { %v689_v15 = vadd.f32 %v688_v13, %v687_v11  ;;  %v553_v19 = vmax.f32 %v509_v14, 0.0 }
 0x1de   :  { %v690_v16 = vpop.f32.mrf.mxu1 }
 0x1df   :  { %v512_v17 = vadd.f32 %v689_v15, %v958_v51 }
 0x1e0   :  { %v691_v18 = vpop.f32.mrf.mxu1 }
 0x1e1   :  { %v554_v20 = vmax.f32 %v512_v17, 0.0  ;;  %v692_v59 = vadd.f32 %v691_v18, %v690_v16 }
 0x1e2   :  { %v693_v21 = vpop.f32.mrf.mxu1 }
 0x1e3   :  { %v567_v22 = vpack.c.bf16 %v554_v20, %v553_v19  ;;  %v517_v63 = vadd.f32 %v692_v59, %v958_v51 }
 0x1e4   :  { %v694_v23 = vpop.f32.mrf.mxu1 }
 0x1e5   :  { %v695_v57 = vadd.f32 %v694_v23, %v693_v21  ;;  %v555_v2 = vmax.f32 %v517_v63, 0.0 }
 0x1e6   :  { %v696_v24 = vpop.f32.mrf.mxu1 }
 0x1e7   :  { %v520_v61 = vadd.f32 %v695_v57, %v958_v51 }
 0x1e8   :  { %v697_v25 = vpop.f32.mrf.mxu1 }
 0x1e9   :  { %v698_v49 = vadd.f32 %v697_v25, %v696_v24  ;;  %v556_v0 = vmax.f32 %v520_v61, 0.0 }
 0x1ea   :  { %v699_v26 = vpop.f32.mrf.mxu1 }
 0x1eb   :  { %v525_v56 = vadd.f32 %v698_v49, %v958_v51  ;;  %v568_v3 = vpack.c.bf16 %v556_v0, %v555_v2 }
 0x1ec   :  { %v700_v27 = vpop.f32.mrf.mxu1 }
 0x1ed   :  { %v701_v47 = vadd.f32 %v700_v27, %v699_v26  ;;  %v557_v60 = vmax.f32 %v525_v56, 0.0 }
 0x1ee   :  { %v702_v28 = vpop.f32.mrf.mxu1 }
 0x1ef   :  { %v528_v53 = vadd.f32 %v701_v47, %v958_v51 }
 0x1f0   :  { %v703_v29 = vpop.f32.mrf.mxu1 }
 0x1f1   :  { %v704_v41 = vadd.f32 %v703_v29, %v702_v28  ;;  %v558_v58 = vmax.f32 %v528_v53, 0.0 }
 0x1f2   :  { %v705_v30 = vpop.f32.mrf.mxu1 }
 0x1f3   :  { %v533_v46 = vadd.f32 %v704_v41, %v958_v51  ;;  %v569_v62 = vpack.c.bf16 %v558_v58, %v557_v60 }
 0x1f4   :  { %v706_v31 = vpop.f32.mrf.mxu1 }
 0x1f5   :  { %v707_v52 = vadd.f32 %v706_v31, %v705_v30  ;;  %v559_v50 = vmax.f32 %v533_v46, 0.0 }
 0x1f6   :  { %v708_v32 = vpop.f32.mrf.mxu1 }
 0x1f7   :  { %v536_v44 = vadd.f32 %v707_v52, %v958_v51 }
 0x1f8   :  { %v709_v33 = vpop.f32.mrf.mxu1 }
 0x1f9   :  { %v710_v34 = vadd.f32 %v709_v33, %v708_v32  ;;  %v560_v48 = vmax.f32 %v536_v44, 0.0 }
 0x1fa   :  { %v711_v35 = vpop.f32.mrf.mxu1 }
 0x1fb   :  { %v541_v37 = vadd.f32 %v710_v34, %v958_v51  ;;  %v570_v55 = vpack.c.bf16 %v560_v48, %v559_v50 }
 0x1fc   :  { %v712_v36 = vpop.f32.mrf.mxu1 }
 0x1fd   :  { %v713_v39 = vadd.f32 %v712_v36, %v711_v35  ;;  %v561_v42 = vmax.f32 %v541_v37, 0.0 }
 0x1ff   :  { %v544_v40 = vadd.f32 %v713_v39, %v958_v51  ;;  %v563_v51 = vld [vmem:[%s1003_s5] sm:$0x1] }
 0x201   :  { %v562_v43 = vmax.f32 %v544_v40, 0.0 }
 0x203   :  { %v571_v45 = vpack.c.bf16 %v562_v43, %v561_v42 }
 0x205   :  { %724 = vmatpush3.bf16.xpose.msra.mxu0 %v571_v45 }
 0x206   :  { %725 = vmatprep.subr.bf16.mxu0 %v847_v38 }
 0x20d   :  { %726 = vmatpush3.bf16.xpose.msra.mxu0 %v570_v55 }
 0x20e   :  { %727 = vmatprep.subr.bf16.mxu0 %v847_v38 }
 0x215   :  { %728 = vmatpush3.bf16.xpose.msra.mxu0 %v569_v62 }
 0x216   :  { %729 = vmatprep.subr.bf16.mxu0 %v847_v38 }
 0x21d   :  { %730 = vmatpush3.bf16.xpose.msra.mxu0 %v568_v3 }
 0x21e   :  { %731 = vmatprep.subr.bf16.mxu0 %v847_v38 }
 0x225   :  { %732 = vmatpush3.bf16.xpose.msra.mxu0 %v567_v22 }
 0x226   :  { %733 = vmatprep.subr.bf16.mxu0 %v847_v38 }
 0x22d   :  { %734 = vmatpush3.bf16.xpose.msra.mxu0 %v566_v12 }
 0x22e   :  { %735 = vmatprep.subr.bf16.mxu0 %v847_v38 }
 0x235   :  { %736 = vmatpush3.bf16.xpose.msra.mxu0 %v966_v1 }
 0x236   :  { %737 = vmatprep.subr.bf16.mxu0 %v847_v38 }
 0x23d   :  { %738 = vmatpush3.bf16.xpose.msra.mxu0 %v962_v54 }
 0x244   :  { %740 = vmatmul.mubr.bf16.vlgmr.msra.gmra.mxu0 %v563_v51 }
 0x304   :  { %v608_v5 = vpop.f32.mrf.mxu0 }
 0x305   :  { %v609_v6 = vadd.f32 %v608_v5, %v573_v4 }
 0x306   :  { %v741_v7 = vpop.f32.mrf.mxu0 }
 0x307   :  { %614 = vst [vmem:[%s1005_s7] sm:$0x1] %v609_v6 }
 0x308   :  { %v611_v1 = vpop.f32.mrf.mxu0 }
 0x30a   :  { %v742_v38 = vpop.f32.mrf.mxu0 }
 0x30b   :  { %619 = vsyncpa [#allocation4], 1 }
 0x30c   :  { %620 = vsyncpa [#allocation6], 1 }

</bundles_post_ra>
